<compile_context>
chip_gen: v7x
topology: tpu7x:2x2x1
jax: 0.10.0
libtpu: 0.0.40
codegen_flags: <defaults>
</compile_context>

<pallas_src>
import functools
import math

import jax
import jax.numpy as jnp
from jax.experimental import pallas as pl
from jax.experimental.pallas import tpu as pltpu


def _round_up(v, m):
    return ((v + m - 1) // m) * m


def _vmem_capacity_bytes():
    """Physical per-core VMEM; conservative 64 MiB (v7x) if the query fails."""
    try:
        cap = getattr(pltpu.get_tpu_info(), "vmem_capacity_bytes", None)
        if cap:
            return int(cap)
    except Exception:
        pass
    return 64 << 20


# Cached capability: can Mosaic lower the (TM, D) -> (TM*D/128, 128) value
# reshape used for lane-dense output stores?  Probed once, then reused.
_LANE_DENSE_OK = {"ok": None}


def _ffn_kernel(x_ref, gamma_ref, beta_ref, w1_ref, b1_ref, w2_ref, b2_ref,
                o_ref, xn_ref, acc_ref, *, eps):
    """One (row-tile, F-tile) grid step.

    Grid = (row tiles, F tiles).  The F axis is the reduction axis of the
    second matmul, so the output block is resident across it (init at f == 0,
    store at f == last).  A single F tile degenerates to the fully
    VMEM-resident-weights fast path.
    """
    f = pl.program_id(1)

    @pl.when(f == 0)
    def _init():
        x = x_ref[...].astype(jnp.float32)
        # LayerNorm over last dim (nn.LayerNorm(D, eps=1e-6)).  E[x^2]-E[x]^2
        # form keeps the two cross-lane (XLU) reductions independent.  All
        # element-wise math stays fp32 (v5e VPU has no bf16).
        inv_d = 1.0 / x.shape[-1]
        mean = jnp.sum(x, axis=-1, keepdims=True) * inv_d
        mean_sq = jnp.sum(x * x, axis=-1, keepdims=True) * inv_d
        var = jnp.maximum(mean_sq - mean * mean, 0.0)
        xn = (x - mean) * jax.lax.rsqrt(var + eps)
        xn = xn * gamma_ref[...] + beta_ref[...]
        xn_ref[...] = xn.astype(jnp.bfloat16)       # cast once per row tile
        acc_ref[...] = jnp.zeros_like(acc_ref)

    # ---- Linear1 + bias + ReLU for this F chunk (bf16 operands, fp32 acc) ----
    h = jnp.dot(xn_ref[...], w1_ref[...], preferred_element_type=jnp.float32)
    h = jnp.maximum(h + b1_ref[...], 0.0)
    # TODO(synk): training-mode dropout (p=0.1) omitted -- inference semantics.

    # ---- Linear2 partial product, accumulated in fp32 over the F tiles ----
    acc_ref[...] += jnp.dot(h.astype(jnp.bfloat16), w2_ref[...],
                            preferred_element_type=jnp.float32)

    @pl.when(f == pl.num_programs(1) - 1)
    def _finalize():
        y = acc_ref[...] + b2_ref[...] + x_ref[...].astype(jnp.float32)
        y = y.astype(o_ref.dtype)
        if o_ref.shape != y.shape:
            # Lane-dense output slab: fold groups of 128/D rows into full
            # 128-lane rows so the store is an unmasked vst.
            y = y.reshape(o_ref.shape)
        o_ref[...] = y


def prepare_ffn_params(gamma, beta, w1, b1, w2, b2, *, eps=1e-6, f_tile=None):
    """Cast / reshape / pad parameters ONCE; reuse the result across calls.

    Picks the F tile (TF): TF == F keeps both weight matrices VMEM-resident;
    otherwise TF is a multiple of 128 chosen so the double-buffered bf16
    weight blocks stay within ~1/3 of the usable VMEM budget (binding on
    v7x's 64 MiB per-core VMEM).
    """
    D, F = w1.shape
    budget = int(0.75 * _vmem_capacity_bytes())
    # 2 pipeline buffers x (w1 block + w2 block) x bf16 = 8 * D * TF bytes.
    if f_tile is not None:
        TF = int(f_tile)
    elif 8 * D * F <= budget // 3:
        TF = F
    else:
        TF = max(128, ((budget // 3) // (8 * D)) // 128 * 128)
        TF = min(TF, F)
    if TF != F and TF % 128 != 0:
        raise ValueError("f_tile must equal F or be a multiple of 128")
    F_pad = _round_up(F, TF)

    if F_pad != F:  # zero-pad the hidden dim: ReLU(0 @ w + 0) contributes 0
        w1 = jnp.pad(w1, ((0, 0), (0, F_pad - F)))
        b1 = jnp.pad(b1, ((0, F_pad - F),))
        w2 = jnp.pad(w2, ((0, F_pad - F), (0, 0)))

    return dict(
        D=D, F=F, F_pad=F_pad, TF=TF, eps=float(eps),
        gamma=gamma.reshape(1, D).astype(jnp.float32),
        beta=beta.reshape(1, D).astype(jnp.float32),
        w1=w1.astype(jnp.bfloat16),                 # cast once, not per call
        b1=b1.reshape(1, F_pad).astype(jnp.float32),
        w2=w2.astype(jnp.bfloat16),
        b2=b2.reshape(1, D).astype(jnp.float32),
    )


def positional_feed_forward(x, params, *, tm=512):
    """x: [..., D] (e.g. [B, S, D]).  `params` from prepare_ffn_params()."""
    D, TF, F_pad, eps = params["D"], params["TF"], params["F_pad"], params["eps"]
    assert x.shape[-1] == D, "last dim of x must equal input_dim"
    lead = x.shape[:-1]
    M = int(math.prod(lead)) if lead else 1
    x2 = x.reshape(M, D)
    out_itemsize = jnp.dtype(x.dtype).itemsize

    # Lane-dense output stores whenever D is not already a multiple of 128.
    lane_dense = (D % 128) != 0
    # TM alignment: 16 for bf16 sublane packing; additionally make TM*D a
    # multiple of 8*128 so the lane-dense output block is (8k, 128).
    row_align = 16
    if lane_dense:
        row_align = max(16, _round_up(1024 // math.gcd(D, 1024), 16))

    # Row tile: large tiles amortize the ~0.35us/step overhead and weight
    # reuse (sweep 512-1024 on v5e/v6e), capped at ceil(M/2) so the parallel
    # row axis has >= 2 tiles for v7x's two TensorCores.
    TM = min(int(tm), _round_up(pl.cdiv(M, 2), row_align))
    TM = _round_up(max(TM, row_align), row_align)

    budget = int(0.75 * _vmem_capacity_bytes())

    def vmem_estimate(tm_rows):
        w_blocks = 2 * (D * TF + TF * D) * 2                 # bf16 w1+w2, 2 bufs
        small = 2 * (3 * D + TF) * 4                         # gamma/beta/b2/b1
        io = 2 * tm_rows * D * (4 + out_itemsize)            # x + out, 2 bufs
        scratch = tm_rows * D * (2 + 4)                      # xn bf16 + acc f32
        tmps = tm_rows * TF * (4 + 2) + 4 * tm_rows * D * 4  # h f32/bf16, x/xn/y
        return w_blocks + small + io + scratch + tmps

    while TM > row_align and vmem_estimate(TM) > budget:
        TM = max(row_align, ((TM // 2) // row_align) * row_align)

    n_row = pl.cdiv(M, TM)
    M_pad = n_row * TM
    if M_pad != M:
        x2 = jnp.pad(x2, ((0, M_pad - M), (0, 0)))
    n_f = F_pad // TF

    vmem_limit = int(min(max(1.25 * vmem_estimate(TM), 8 << 20), budget))

    def run(use_lane_dense):
        if use_lane_dense:
            out_shape = jax.ShapeDtypeStruct(((M_pad * D) // 128, 128), x.dtype)
            out_block = ((TM * D) // 128, 128)
        else:
            out_shape = jax.ShapeDtypeStruct((M_pad, D), x.dtype)
            out_block = (TM, D)
        grid_spec = pltpu.PrefetchScalarGridSpec(
            num_scalar_prefetch=0,
            grid=(n_row, n_f),                               # reduction axis last
            in_specs=[
                pl.BlockSpec((TM, D), lambda i, f: (i, 0)),   # x row tile
                pl.BlockSpec((1, D), lambda i, f: (0, 0)),    # gamma (resident)
                pl.BlockSpec((1, D), lambda i, f: (0, 0)),    # beta
                pl.BlockSpec((D, TF), lambda i, f: (0, f)),   # w1 chunk (bf16)
                pl.BlockSpec((1, TF), lambda i, f: (0, f)),   # b1 chunk
                pl.BlockSpec((TF, D), lambda i, f: (f, 0)),   # w2 chunk (bf16)
                pl.BlockSpec((1, D), lambda i, f: (0, 0)),    # b2
            ],
            out_specs=pl.BlockSpec(out_block, lambda i, f: (i, 0)),
            scratch_shapes=[
                pltpu.VMEM((TM, D), jnp.bfloat16),   # normalized activations
                pltpu.VMEM((TM, D), jnp.float32),    # fp32 output accumulator
            ],
        )
        return pl.pallas_call(
            functools.partial(_ffn_kernel, eps=eps),
            out_shape=out_shape,
            grid_spec=grid_spec,
            compiler_params=pltpu.CompilerParams(
                dimension_semantics=("parallel", "arbitrary"),
                vmem_limit_bytes=vmem_limit,
            ),
        )(x2, params["gamma"], params["beta"], params["w1"], params["b1"],
          params["w2"], params["b2"])

    out2 = None
    if (lane_dense and (TM * D) % (8 * 128) == 0
            and _LANE_DENSE_OK["ok"] is not False):
        try:
            out_flat = run(True)
            if _LANE_DENSE_OK["ok"] is None:
                jax.block_until_ready(out_flat)  # surface compile errors now
                _LANE_DENSE_OK["ok"] = True
            out2 = out_flat.reshape(M_pad, D)    # free: row-major metadata only
        except Exception:
            _LANE_DENSE_OK["ok"] = False         # Mosaic rejected the reshape
    if out2 is None:
        out2 = run(False)

    if M_pad != M:
        out2 = out2[:M]
    return out2.reshape(*lead, D)


def _reference(x, gamma, beta, w1, b1, w2, b2, eps=1e-6, mm_dtype=jnp.float32):
    mean = jnp.mean(x, axis=-1, keepdims=True)
    var = jnp.mean((x - mean) ** 2, axis=-1, keepdims=True)
    xn = (x - mean) * jax.lax.rsqrt(var + eps) * gamma + beta
    h = jnp.dot(xn.astype(mm_dtype), w1.astype(mm_dtype),
                preferred_element_type=jnp.float32) + b1
    h = jnp.maximum(h, 0.0)
    y = jnp.dot(h.astype(mm_dtype), w2.astype(mm_dtype),
                preferred_element_type=jnp.float32) + b2
    return y + x


def _run_case(key, B, S, D, F, *, tm=512, f_tile=None):
    kx, k1, k2, k3, k4 = jax.random.split(key, 5)
    x = jax.random.normal(kx, (B, S, D), dtype=jnp.float32)
    w1 = jax.random.normal(k1, (D, F), dtype=jnp.float32) * (1.0 / math.sqrt(D))
    b1 = jax.random.normal(k2, (F,), dtype=jnp.float32) * 0.01
    w2 = jax.random.normal(k3, (F, D), dtype=jnp.float32) * (1.0 / math.sqrt(F))
    b2 = jax.random.normal(k4, (D,), dtype=jnp.float32) * 0.01
    gamma = jnp.ones((D,), dtype=jnp.float32)
    beta = jnp.zeros((D,), dtype=jnp.float32)

    params = prepare_ffn_params(gamma, beta, w1, b1, w2, b2, f_tile=f_tile)
    out = positional_feed_forward(x, params, tm=tm)
    out = jax.block_until_ready(out)
    assert out.shape == (B, S, D)

    # Tight check vs a reference mirroring the kernel's bf16 matmul operands.
    ref_bf16 = _reference(x, gamma, beta, w1, b1, w2, b2, mm_dtype=jnp.bfloat16)
    assert jnp.allclose(out, ref_bf16, atol=5e-3, rtol=5e-3), \
        "mismatch vs bf16-operand reference"
    # Looser check vs the pure-fp32 PyTorch-equivalent reference.
    ref_f32 = _reference(x, gamma, beta, w1, b1, w2, b2, mm_dtype=jnp.float32)
    assert jnp.allclose(out, ref_f32, atol=4e-2, rtol=4e-2), \
        "mismatch vs fp32 reference"


if __name__ == "__main__":
    key = jax.random.PRNGKey(0)
    k_a, k_b, k_c = jax.random.split(key, 3)

    # Module-sized shape: batch=2, seq=8, input_dim=32, ff_dim=64.
    _run_case(k_a, B=2, S=8, D=32, F=64)

    # Multiple row tiles + row padding (M=288, TM=64 -> 5 row tiles).
    _run_case(k_b, B=4, S=72, D=32, F=64, tm=64)

    # Forced F-tiling (F=256 streamed as two 128-wide chunks): exercises the
    # fp32 accumulator + pl.when init/finalize path used when the weights are
    # too large to stay fully VMEM-resident (e.g. on v7x's 64 MiB VMEM).
    _run_case(k_c, B=2, S=16, D=32, F=256, f_tile=128)

    print("KERNEL_OK")
</pallas_src>

<mosaic_0001>
module attributes {stable_mosaic.version = 11 : i64} {
  func.func @_ffn_kernel(%arg0: i32, %arg1: i32, %arg2: memref<32x32xf32, #tpu.memory_space<vmem>>, %arg3: memref<1x32xf32, #tpu.memory_space<vmem>>, %arg4: memref<1x32xf32, #tpu.memory_space<vmem>>, %arg5: memref<32x64xbf16, #tpu.memory_space<vmem>>, %arg6: memref<1x64xf32, #tpu.memory_space<vmem>>, %arg7: memref<64x32xbf16, #tpu.memory_space<vmem>>, %arg8: memref<1x32xf32, #tpu.memory_space<vmem>>, %arg9: memref<8x128xf32, #tpu.memory_space<vmem>>, %arg10: memref<32x32xbf16, #tpu.memory_space<vmem>>, %arg11: memref<32x32xf32, #tpu.memory_space<vmem>>) attributes {dimension_semantics = [#tpu.dimension_semantics<parallel>, #tpu.dimension_semantics<arbitrary>], iteration_bounds = array<i64: 1, 1>, scalar_prefetch = 0 : i64, scratch_operands = 2 : i64, tpu.core_type = #tpu.core_type<tc>, window_params = [{transform_indices = @transform_0, window_bounds = array<i64: 32, 32>}, {pipeline_mode = #tpu.pipeline_mode<synchronous>, transform_indices = @transform_1, window_bounds = array<i64: 1, 32>}, {pipeline_mode = #tpu.pipeline_mode<synchronous>, transform_indices = @transform_2, window_bounds = array<i64: 1, 32>}, {transform_indices = @transform_3, window_bounds = array<i64: 32, 64>}, {transform_indices = @transform_4, window_bounds = array<i64: 1, 64>}, {transform_indices = @transform_5, window_bounds = array<i64: 64, 32>}, {pipeline_mode = #tpu.pipeline_mode<synchronous>, transform_indices = @transform_6, window_bounds = array<i64: 1, 32>}, {transform_indices = @transform_7, window_bounds = array<i64: 8, 128>}]} {
    %c0_i32 = arith.constant 0 : i32
    %0 = arith.cmpi eq, %arg1, %c0_i32 : i32
    %1 = arith.extui %0 : i1 to i32
    %c0_i32_0 = arith.constant 0 : i32
    %2 = arith.cmpi ne, %1, %c0_i32_0 : i32
    scf.if %2 {
      %c0_16 = arith.constant 0 : index
      %c0_17 = arith.constant 0 : index
      %20 = vector.load %arg2[%c0_16, %c0_17] : memref<32x32xf32, #tpu.memory_space<vmem>>, vector<32x32xf32>
      %cst_18 = arith.constant dense<0.000000e+00> : vector<32xf32>
      %21 = vector.multi_reduction <add>, %20, %cst_18 [1] : vector<32x32xf32> to vector<32xf32>
      %22 = vector.shape_cast %21 : vector<32xf32> to vector<32x1xf32>
      %cst_19 = arith.constant 3.125000e-02 : f32
      %23 = vector.broadcast %cst_19 : f32 to vector<32x1xf32>
      %24 = arith.mulf %22, %23 : vector<32x1xf32>
      %25 = arith.mulf %20, %20 : vector<32x32xf32>
      %cst_20 = arith.constant dense<0.000000e+00> : vector<32xf32>
      %26 = vector.multi_reduction <add>, %25, %cst_20 [1] : vector<32x32xf32> to vector<32xf32>
      %27 = vector.shape_cast %26 : vector<32xf32> to vector<32x1xf32>
      %cst_21 = arith.constant 3.125000e-02 : f32
      %28 = vector.broadcast %cst_21 : f32 to vector<32x1xf32>
      %29 = arith.mulf %27, %28 : vector<32x1xf32>
      %30 = arith.mulf %24, %24 : vector<32x1xf32>
      %31 = arith.subf %29, %30 : vector<32x1xf32>
      %cst_22 = arith.constant 0.000000e+00 : f32
      %32 = vector.broadcast %cst_22 : f32 to vector<32x1xf32>
      %33 = arith.maximumf %31, %32 : vector<32x1xf32>
      %34 = vector.broadcast %24 : vector<32x1xf32> to vector<32x32xf32>
      %35 = arith.subf %20, %34 : vector<32x32xf32>
      %cst_23 = arith.constant 9.99999997E-7 : f32
      %36 = vector.broadcast %cst_23 : f32 to vector<32x1xf32>
      %37 = arith.addf %33, %36 : vector<32x1xf32>
      %38 = math.rsqrt %37 : vector<32x1xf32>
      %39 = vector.broadcast %38 : vector<32x1xf32> to vector<32x32xf32>
      %40 = arith.mulf %35, %39 : vector<32x32xf32>
      %c0_24 = arith.constant 0 : index
      %c0_25 = arith.constant 0 : index
      %41 = vector.load %arg3[%c0_24, %c0_25] : memref<1x32xf32, #tpu.memory_space<vmem>>, vector<1x32xf32>
      %42 = vector.broadcast %41 : vector<1x32xf32> to vector<32x32xf32>
      %43 = arith.mulf %40, %42 : vector<32x32xf32>
      %c0_26 = arith.constant 0 : index
      %c0_27 = arith.constant 0 : index
      %44 = vector.load %arg4[%c0_26, %c0_27] : memref<1x32xf32, #tpu.memory_space<vmem>>, vector<1x32xf32>
      %45 = vector.broadcast %44 : vector<1x32xf32> to vector<32x32xf32>
      %46 = arith.addf %43, %45 : vector<32x32xf32>
      %47 = arith.truncf %46 : vector<32x32xf32> to vector<32x32xbf16>
      %c0_28 = arith.constant 0 : index
      %c0_29 = arith.constant 0 : index
      %48 = vector.load %arg10[%c0_28, %c0_29] : memref<32x32xbf16, #tpu.memory_space<vmem>>, vector<32x32xbf16>
      tpu.vector_store %arg10[%c0_28, %c0_29], %47 {strides = array<i32>} : memref<32x32xbf16, #tpu.memory_space<vmem>>, vector<32x32xbf16>,
      %cst_30 = arith.constant 0.000000e+00 : f32
      %49 = vector.broadcast %cst_30 : f32 to vector<32x32xf32>
      %c0_31 = arith.constant 0 : index
      %c0_32 = arith.constant 0 : index
      %50 = vector.load %arg11[%c0_31, %c0_32] : memref<32x32xf32, #tpu.memory_space<vmem>>, vector<32x32xf32>
      tpu.vector_store %arg11[%c0_31, %c0_32], %49 {strides = array<i32>} : memref<32x32xf32, #tpu.memory_space<vmem>>, vector<32x32xf32>,
    } else {
    }
    %c0 = arith.constant 0 : index
    %c0_1 = arith.constant 0 : index
    %3 = vector.load %arg10[%c0, %c0_1] : memref<32x32xbf16, #tpu.memory_space<vmem>>, vector<32x32xbf16>
    %c0_2 = arith.constant 0 : index
    %c0_3 = arith.constant 0 : index
    %4 = vector.load %arg5[%c0_2, %c0_3] : memref<32x64xbf16, #tpu.memory_space<vmem>>, vector<32x64xbf16>
    %cst = arith.constant dense<0.000000e+00> : vector<32x64xf32>
    %5 = tpu.matmul %3, %4, %cst {dimension_numbers = #tpu.dot_dimension_numbers<[1], [0], [0], [1], [0, 0, 1, 1], [], []>} : vector<32x32xbf16>, vector<32x64xbf16>, vector<32x64xf32> -> vector<32x64xf32>
    %c0_4 = arith.constant 0 : index
    %c0_5 = arith.constant 0 : index
    %6 = vector.load %arg6[%c0_4, %c0_5] : memref<1x64xf32, #tpu.memory_space<vmem>>, vector<1x64xf32>
    %7 = vector.broadcast %6 : vector<1x64xf32> to vector<32x64xf32>
    %8 = arith.addf %5, %7 : vector<32x64xf32>
    %cst_6 = arith.constant 0.000000e+00 : f32
    %9 = vector.broadcast %cst_6 : f32 to vector<32x64xf32>
    %10 = arith.maximumf %8, %9 : vector<32x64xf32>
    %c0_7 = arith.constant 0 : index
    %c0_8 = arith.constant 0 : index
    %11 = vector.load %arg11[%c0_7, %c0_8] : memref<32x32xf32, #tpu.memory_space<vmem>>, vector<32x32xf32>
    %12 = arith.truncf %10 : vector<32x64xf32> to vector<32x64xbf16>
    %c0_9 = arith.constant 0 : index
    %c0_10 = arith.constant 0 : index
    %13 = vector.load %arg7[%c0_9, %c0_10] : memref<64x32xbf16, #tpu.memory_space<vmem>>, vector<64x32xbf16>
    %cst_11 = arith.constant dense<0.000000e+00> : vector<32x32xf32>
    %14 = tpu.matmul %12, %13, %cst_11 {dimension_numbers = #tpu.dot_dimension_numbers<[1], [0], [0], [1], [0, 0, 1, 1], [], []>} : vector<32x64xbf16>, vector<64x32xbf16>, vector<32x32xf32> -> vector<32x32xf32>
    %15 = arith.addf %11, %14 : vector<32x32xf32>
    %c0_12 = arith.constant 0 : index
    %c0_13 = arith.constant 0 : index
    %16 = vector.load %arg11[%c0_12, %c0_13] : memref<32x32xf32, #tpu.memory_space<vmem>>, vector<32x32xf32>
    tpu.vector_store %arg11[%c0_12, %c0_13], %15 {strides = array<i32>} : memref<32x32xf32, #tpu.memory_space<vmem>>, vector<32x32xf32>,
    %c0_i32_14 = arith.constant 0 : i32
    %17 = arith.cmpi eq, %arg1, %c0_i32_14 : i32
    %18 = arith.extui %17 : i1 to i32
    %c0_i32_15 = arith.constant 0 : i32
    %19 = arith.cmpi ne, %18, %c0_i32_15 : i32
    scf.if %19 {
      %c0_16 = arith.constant 0 : index
      %c0_17 = arith.constant 0 : index
      %20 = vector.load %arg11[%c0_16, %c0_17] : memref<32x32xf32, #tpu.memory_space<vmem>>, vector<32x32xf32>
      %c0_18 = arith.constant 0 : index
      %c0_19 = arith.constant 0 : index
      %21 = vector.load %arg8[%c0_18, %c0_19] : memref<1x32xf32, #tpu.memory_space<vmem>>, vector<1x32xf32>
      %22 = vector.broadcast %21 : vector<1x32xf32> to vector<32x32xf32>
      %23 = arith.addf %20, %22 : vector<32x32xf32>
      %c0_20 = arith.constant 0 : index
      %c0_21 = arith.constant 0 : index
      %24 = vector.load %arg2[%c0_20, %c0_21] : memref<32x32xf32, #tpu.memory_space<vmem>>, vector<32x32xf32>
      %25 = arith.addf %23, %24 : vector<32x32xf32>
      %26 = vector.shape_cast %25 : vector<32x32xf32> to vector<8x128xf32>
      %c0_22 = arith.constant 0 : index
      %c0_23 = arith.constant 0 : index
      %27 = vector.load %arg9[%c0_22, %c0_23] : memref<8x128xf32, #tpu.memory_space<vmem>>, vector<8x128xf32>
      tpu.vector_store %arg9[%c0_22, %c0_23], %26 {strides = array<i32>} : memref<8x128xf32, #tpu.memory_space<vmem>>, vector<8x128xf32>,
    } else {
    }
    return
  }
  func.func @transform_0(%arg0: i32, %arg1: i32) -> (i32, i32) {
    %c0_i32 = arith.constant 0 : i32
    %c0_i32_0 = arith.constant 0 : i32
    return %arg0, %c0_i32 : i32, i32
  }
  func.func @transform_1(%arg0: i32, %arg1: i32) -> (i32, i32) {
    %c0_i32 = arith.constant 0 : i32
    %c0_i32_0 = arith.constant 0 : i32
    %c0_i32_1 = arith.constant 0 : i32
    return %c0_i32, %c0_i32_0 : i32, i32
  }
  func.func @transform_2(%arg0: i32, %arg1: i32) -> (i32, i32) {
    %c0_i32 = arith.constant 0 : i32
    %c0_i32_0 = arith.constant 0 : i32
    %c0_i32_1 = arith.constant 0 : i32
    return %c0_i32, %c0_i32_0 : i32, i32
  }
  func.func @transform_3(%arg0: i32, %arg1: i32) -> (i32, i32) {
    %c0_i32 = arith.constant 0 : i32
    %c0_i32_0 = arith.constant 0 : i32
    return %c0_i32, %arg1 : i32, i32
  }
  func.func @transform_4(%arg0: i32, %arg1: i32) -> (i32, i32) {
    %c0_i32 = arith.constant 0 : i32
    %c0_i32_0 = arith.constant 0 : i32
    return %c0_i32, %arg1 : i32, i32
  }
  func.func @transform_5(%arg0: i32, %arg1: i32) -> (i32, i32) {
    %c0_i32 = arith.constant 0 : i32
    %c0_i32_0 = arith.constant 0 : i32
    return %arg1, %c0_i32 : i32, i32
  }
  func.func @transform_6(%arg0: i32, %arg1: i32) -> (i32, i32) {
    %c0_i32 = arith.constant 0 : i32
    %c0_i32_0 = arith.constant 0 : i32
    %c0_i32_1 = arith.constant 0 : i32
    return %c0_i32, %c0_i32_0 : i32, i32
  }
  func.func @transform_7(%arg0: i32, %arg1: i32) -> (i32, i32) {
    %c0_i32 = arith.constant 0 : i32
    %c0_i32_0 = arith.constant 0 : i32
    return %arg0, %c0_i32 : i32, i32
  }
}

module attributes {stable_mosaic.version = 11 : i64} {
  func.func @_ffn_kernel(%arg0: i32, %arg1: i32, %arg2: memref<32x32xf32, #tpu.memory_space<vmem>>, %arg3: memref<1x32xf32, #tpu.memory_space<vmem>>, %arg4: memref<1x32xf32, #tpu.memory_space<vmem>>, %arg5: memref<32x64xbf16, #tpu.memory_space<vmem>>, %arg6: memref<1x64xf32, #tpu.memory_space<vmem>>, %arg7: memref<64x32xbf16, #tpu.memory_space<vmem>>, %arg8: memref<1x32xf32, #tpu.memory_space<vmem>>, %arg9: memref<32x32xf32, #tpu.memory_space<vmem>>, %arg10: memref<32x32xbf16, #tpu.memory_space<vmem>>, %arg11: memref<32x32xf32, #tpu.memory_space<vmem>>) attributes {dimension_semantics = [#tpu.dimension_semantics<parallel>, #tpu.dimension_semantics<arbitrary>], iteration_bounds = array<i64: 1, 1>, scalar_prefetch = 0 : i64, scratch_operands = 2 : i64, tpu.core_type = #tpu.core_type<tc>, window_params = [{transform_indices = @transform_0, window_bounds = array<i64: 32, 32>}, {pipeline_mode = #tpu.pipeline_mode<synchronous>, transform_indices = @transform_1, window_bounds = array<i64: 1, 32>}, {pipeline_mode = #tpu.pipeline_mode<synchronous>, transform_indices = @transform_2, window_bounds = array<i64: 1, 32>}, {transform_indices = @transform_3, window_bounds = array<i64: 32, 64>}, {transform_indices = @transform_4, window_bounds = array<i64: 1, 64>}, {transform_indices = @transform_5, window_bounds = array<i64: 64, 32>}, {pipeline_mode = #tpu.pipeline_mode<synchronous>, transform_indices = @transform_6, window_bounds = array<i64: 1, 32>}, {transform_indices = @transform_7, window_bounds = array<i64: 32, 32>}]} {
    %c0_i32 = arith.constant 0 : i32
    %0 = arith.cmpi eq, %arg1, %c0_i32 : i32
    %1 = arith.extui %0 : i1 to i32
    %c0_i32_0 = arith.constant 0 : i32
    %2 = arith.cmpi ne, %1, %c0_i32_0 : i32
    scf.if %2 {
      %c0_16 = arith.constant 0 : index
      %c0_17 = arith.constant 0 : index
      %20 = vector.load %arg2[%c0_16, %c0_17] : memref<32x32xf32, #tpu.memory_space<vmem>>, vector<32x32xf32>
      %cst_18 = arith.constant dense<0.000000e+00> : vector<32xf32>
      %21 = vector.multi_reduction <add>, %20, %cst_18 [1] : vector<32x32xf32> to vector<32xf32>
      %22 = vector.shape_cast %21 : vector<32xf32> to vector<32x1xf32>
      %cst_19 = arith.constant 3.125000e-02 : f32
      %23 = vector.broadcast %cst_19 : f32 to vector<32x1xf32>
      %24 = arith.mulf %22, %23 : vector<32x1xf32>
      %25 = arith.mulf %20, %20 : vector<32x32xf32>
      %cst_20 = arith.constant dense<0.000000e+00> : vector<32xf32>
      %26 = vector.multi_reduction <add>, %25, %cst_20 [1] : vector<32x32xf32> to vector<32xf32>
      %27 = vector.shape_cast %26 : vector<32xf32> to vector<32x1xf32>
      %cst_21 = arith.constant 3.125000e-02 : f32
      %28 = vector.broadcast %cst_21 : f32 to vector<32x1xf32>
      %29 = arith.mulf %27, %28 : vector<32x1xf32>
      %30 = arith.mulf %24, %24 : vector<32x1xf32>
      %31 = arith.subf %29, %30 : vector<32x1xf32>
      %cst_22 = arith.constant 0.000000e+00 : f32
      %32 = vector.broadcast %cst_22 : f32 to vector<32x1xf32>
      %33 = arith.maximumf %31, %32 : vector<32x1xf32>
      %34 = vector.broadcast %24 : vector<32x1xf32> to vector<32x32xf32>
      %35 = arith.subf %20, %34 : vector<32x32xf32>
      %cst_23 = arith.constant 9.99999997E-7 : f32
      %36 = vector.broadcast %cst_23 : f32 to vector<32x1xf32>
      %37 = arith.addf %33, %36 : vector<32x1xf32>
      %38 = math.rsqrt %37 : vector<32x1xf32>
      %39 = vector.broadcast %38 : vector<32x1xf32> to vector<32x32xf32>
      %40 = arith.mulf %35, %39 : vector<32x32xf32>
      %c0_24 = arith.constant 0 : index
      %c0_25 = arith.constant 0 : index
      %41 = vector.load %arg3[%c0_24, %c0_25] : memref<1x32xf32, #tpu.memory_space<vmem>>, vector<1x32xf32>
      %42 = vector.broadcast %41 : vector<1x32xf32> to vector<32x32xf32>
      %43 = arith.mulf %40, %42 : vector<32x32xf32>
      %c0_26 = arith.constant 0 : index
      %c0_27 = arith.constant 0 : index
      %44 = vector.load %arg4[%c0_26, %c0_27] : memref<1x32xf32, #tpu.memory_space<vmem>>, vector<1x32xf32>
      %45 = vector.broadcast %44 : vector<1x32xf32> to vector<32x32xf32>
      %46 = arith.addf %43, %45 : vector<32x32xf32>
      %47 = arith.truncf %46 : vector<32x32xf32> to vector<32x32xbf16>
      %c0_28 = arith.constant 0 : index
      %c0_29 = arith.constant 0 : index
      %48 = vector.load %arg10[%c0_28, %c0_29] : memref<32x32xbf16, #tpu.memory_space<vmem>>, vector<32x32xbf16>
      tpu.vector_store %arg10[%c0_28, %c0_29], %47 {strides = array<i32>} : memref<32x32xbf16, #tpu.memory_space<vmem>>, vector<32x32xbf16>,
      %cst_30 = arith.constant 0.000000e+00 : f32
      %49 = vector.broadcast %cst_30 : f32 to vector<32x32xf32>
      %c0_31 = arith.constant 0 : index
      %c0_32 = arith.constant 0 : index
      %50 = vector.load %arg11[%c0_31, %c0_32] : memref<32x32xf32, #tpu.memory_space<vmem>>, vector<32x32xf32>
      tpu.vector_store %arg11[%c0_31, %c0_32], %49 {strides = array<i32>} : memref<32x32xf32, #tpu.memory_space<vmem>>, vector<32x32xf32>,
    } else {
    }
    %c0 = arith.constant 0 : index
    %c0_1 = arith.constant 0 : index
    %3 = vector.load %arg10[%c0, %c0_1] : memref<32x32xbf16, #tpu.memory_space<vmem>>, vector<32x32xbf16>
    %c0_2 = arith.constant 0 : index
    %c0_3 = arith.constant 0 : index
    %4 = vector.load %arg5[%c0_2, %c0_3] : memref<32x64xbf16, #tpu.memory_space<vmem>>, vector<32x64xbf16>
    %cst = arith.constant dense<0.000000e+00> : vector<32x64xf32>
    %5 = tpu.matmul %3, %4, %cst {dimension_numbers = #tpu.dot_dimension_numbers<[1], [0], [0], [1], [0, 0, 1, 1], [], []>} : vector<32x32xbf16>, vector<32x64xbf16>, vector<32x64xf32> -> vector<32x64xf32>
    %c0_4 = arith.constant 0 : index
    %c0_5 = arith.constant 0 : index
    %6 = vector.load %arg6[%c0_4, %c0_5] : memref<1x64xf32, #tpu.memory_space<vmem>>, vector<1x64xf32>
    %7 = vector.broadcast %6 : vector<1x64xf32> to vector<32x64xf32>
    %8 = arith.addf %5, %7 : vector<32x64xf32>
    %cst_6 = arith.constant 0.000000e+00 : f32
    %9 = vector.broadcast %cst_6 : f32 to vector<32x64xf32>
    %10 = arith.maximumf %8, %9 : vector<32x64xf32>
    %c0_7 = arith.constant 0 : index
    %c0_8 = arith.constant 0 : index
    %11 = vector.load %arg11[%c0_7, %c0_8] : memref<32x32xf32, #tpu.memory_space<vmem>>, vector<32x32xf32>
    %12 = arith.truncf %10 : vector<32x64xf32> to vector<32x64xbf16>
    %c0_9 = arith.constant 0 : index
    %c0_10 = arith.constant 0 : index
    %13 = vector.load %arg7[%c0_9, %c0_10] : memref<64x32xbf16, #tpu.memory_space<vmem>>, vector<64x32xbf16>
    %cst_11 = arith.constant dense<0.000000e+00> : vector<32x32xf32>
    %14 = tpu.matmul %12, %13, %cst_11 {dimension_numbers = #tpu.dot_dimension_numbers<[1], [0], [0], [1], [0, 0, 1, 1], [], []>} : vector<32x64xbf16>, vector<64x32xbf16>, vector<32x32xf32> -> vector<32x32xf32>
    %15 = arith.addf %11, %14 : vector<32x32xf32>
    %c0_12 = arith.constant 0 : index
    %c0_13 = arith.constant 0 : index
    %16 = vector.load %arg11[%c0_12, %c0_13] : memref<32x32xf32, #tpu.memory_space<vmem>>, vector<32x32xf32>
    tpu.vector_store %arg11[%c0_12, %c0_13], %15 {strides = array<i32>} : memref<32x32xf32, #tpu.memory_space<vmem>>, vector<32x32xf32>,
    %c0_i32_14 = arith.constant 0 : i32
    %17 = arith.cmpi eq, %arg1, %c0_i32_14 : i32
    %18 = arith.extui %17 : i1 to i32
    %c0_i32_15 = arith.constant 0 : i32
    %19 = arith.cmpi ne, %18, %c0_i32_15 : i32
    scf.if %19 {
      %c0_16 = arith.constant 0 : index
      %c0_17 = arith.constant 0 : index
      %20 = vector.load %arg11[%c0_16, %c0_17] : memref<32x32xf32, #tpu.memory_space<vmem>>, vector<32x32xf32>
      %c0_18 = arith.constant 0 : index
      %c0_19 = arith.constant 0 : index
      %21 = vector.load %arg8[%c0_18, %c0_19] : memref<1x32xf32, #tpu.memory_space<vmem>>, vector<1x32xf32>
      %22 = vector.broadcast %21 : vector<1x32xf32> to vector<32x32xf32>
      %23 = arith.addf %20, %22 : vector<32x32xf32>
      %c0_20 = arith.constant 0 : index
      %c0_21 = arith.constant 0 : index
      %24 = vector.load %arg2[%c0_20, %c0_21] : memref<32x32xf32, #tpu.memory_space<vmem>>, vector<32x32xf32>
      %25 = arith.addf %23, %24 : vector<32x32xf32>
      %c0_22 = arith.constant 0 : index
      %c0_23 = arith.constant 0 : index
      %26 = vector.load %arg9[%c0_22, %c0_23] : memref<32x32xf32, #tpu.memory_space<vmem>>, vector<32x32xf32>
      tpu.vector_store %arg9[%c0_22, %c0_23], %25 {strides = array<i32>} : memref<32x32xf32, #tpu.memory_space<vmem>>, vector<32x32xf32>,
    } else {
    }
    return
  }
  func.func @transform_0(%arg0: i32, %arg1: i32) -> (i32, i32) {
    %c0_i32 = arith.constant 0 : i32
    %c0_i32_0 = arith.constant 0 : i32
    return %arg0, %c0_i32 : i32, i32
  }
  func.func @transform_1(%arg0: i32, %arg1: i32) -> (i32, i32) {
    %c0_i32 = arith.constant 0 : i32
    %c0_i32_0 = arith.constant 0 : i32
    %c0_i32_1 = arith.constant 0 : i32
    return %c0_i32, %c0_i32_0 : i32, i32
  }
  func.func @transform_2(%arg0: i32, %arg1: i32) -> (i32, i32) {
    %c0_i32 = arith.constant 0 : i32
    %c0_i32_0 = arith.constant 0 : i32
    %c0_i32_1 = arith.constant 0 : i32
    return %c0_i32, %c0_i32_0 : i32, i32
  }
  func.func @transform_3(%arg0: i32, %arg1: i32) -> (i32, i32) {
    %c0_i32 = arith.constant 0 : i32
    %c0_i32_0 = arith.constant 0 : i32
    return %c0_i32, %arg1 : i32, i32
  }
  func.func @transform_4(%arg0: i32, %arg1: i32) -> (i32, i32) {
    %c0_i32 = arith.constant 0 : i32
    %c0_i32_0 = arith.constant 0 : i32
    return %c0_i32, %arg1 : i32, i32
  }
  func.func @transform_5(%arg0: i32, %arg1: i32) -> (i32, i32) {
    %c0_i32 = arith.constant 0 : i32
    %c0_i32_0 = arith.constant 0 : i32
    return %arg1, %c0_i32 : i32, i32
  }
  func.func @transform_6(%arg0: i32, %arg1: i32) -> (i32, i32) {
    %c0_i32 = arith.constant 0 : i32
    %c0_i32_0 = arith.constant 0 : i32
    %c0_i32_1 = arith.constant 0 : i32
    return %c0_i32, %c0_i32_0 : i32, i32
  }
  func.func @transform_7(%arg0: i32, %arg1: i32) -> (i32, i32) {
    %c0_i32 = arith.constant 0 : i32
    %c0_i32_0 = arith.constant 0 : i32
    return %arg0, %c0_i32 : i32, i32
  }
}

</mosaic_0001>

<bundles_post_ra>
// kernel: tpu_custom_call.1
= control target key start
LH: loop header
LB: loop body
LE: loop exit
PB: predicated region body
PF: predicated region fallthrough
CT: control target
= control target key end

     0   :  { %12 = vsyncpa [#allocation5], 0  ;;  %s648_s0 = inlined_call_operand.vmem [shape: f32[32,32], index: 0, kind: input, shape index: {}]   ;;  %s649_s1 = inlined_call_operand.vmem [shape: f32[1,32], index: 1, kind: input, shape index: {}]   ;;  %s650_s2 = inlined_call_operand.vmem [shape: f32[1,32], index: 2, kind: input, shape index: {}]   ;;  %s651_s3 = inlined_call_operand.vmem [shape: bf16[32,64], index: 3, kind: input, shape index: {}]   ;;  %s652_s4 = inlined_call_operand.hbm [shape: f32[1,64], index: 4, kind: input, shape index: {}]   ;;  %s653_s5 = inlined_call_operand.vmem [shape: bf16[64,32], index: 5, kind: input, shape index: {}]   ;;  %s654_s6 = inlined_call_operand.vmem [shape: f32[1,32], index: 6, kind: input, shape index: {}]   ;;  %s655_s7 = inlined_call_operand.hbm [shape: f32[32,32], index: 7, kind: output, shape index: {}]  }
   0x1   :  { %13 = vsyncpa [#allocation6], 0  ;;  %s488_s24 = smov [#allocation4]   ;;  %s440_s28 = scalar_lea.hbm %s652_s4, 16 }
   0x2   :  { %s28_s25 = sshll.u32 %s488_s24, 4  ;;  %p441_p0 = scmp.ne.s32.totalorder %s652_s4, %s440_s28  ;;  %s29_s25 = int_to_ptr.vmem [resolvable:$true] %s28_s25 }
   0x3   :  { %p444_p1 = scmp.lt.u32.totalorder %s440_s28, %s652_s4 }
   0x5   :  { %p446_p2 = pnand %p444_p1, %p441_p0 }
   0x7   :  { %449 = shalt.err (!%p446_p2)
}
   0x8   :  { %s450_s10 = scalar_lea.vmem %s29_s25, 16  ;;  %s454_s11 = scalar_lea.vmem %s29_s25, 32 }
   0x9   :  { %p451_p3 = scmp.ne.s32.totalorder %s29_s25, %s450_s10  ;;  %p455_p4 = scmp.lt.s32.totalorder %s29_s25, %s29_s25 }
   0xa   :  { %p456_p5 = scmp.lt.s32.totalorder %s454_s11, %s450_s10 }
   0xc   :  { %p457_p6 = por %p456_p5, %p455_p4 }
   0xe   :  { %p458_p7 = pnand %p457_p6, %p451_p3 }
  0x10   :  { %461 = shalt.err (!%p458_p7)
}
  0x11   :  { %31 = dma.hbm_to_vmem [thread:$0]  %s652_s4, 16, %s29_s25, [#allocation5]  }
  0x12   :  { %484 = dma.done.wait [#allocation5], 16  }
  0x13   :  { %485 = vsyncadd [#allocation5], 4294967280  ;;  %vm48_vm0 = vcmask 261120   ;;  %v548_v0 = vld [vmem:[%s648_s0 + $0x10] sm:$0xff]  ;;  %v553_v1 = vld [vmem:[%s648_s0] sm:$0xff]  ;;  %vm266_vm1 = vcmask 523264  }
  0x14   :  { %v558_v2 = vld [vmem:[%s648_s0 + $0x18] sm:$0xff]  ;;  %v55_v3 = vsel %vm48_vm0, %v548_v0, 0.0  ;;  %v49_v4 = vsel %vm48_vm0, %v553_v1, 0.0  ;;  %v567_v5 = vld [vmem:[%s648_s0 + $0x8] sm:$0xff]  ;;  %v65_v9 = vmul.f32 %v553_v1, %v553_v1  ;;  %v67_v13 = vmul.f32 %v548_v0, %v548_v0  ;;  %v426_v16 = vld [vmem:[%s651_s3] sm:$0xff]   ;;  %s490_s11 = smov [#allocation7]  }
  0x15   :  { %56 = vadd.xlane.f32.xlu1 %v55_v3  ;;  %50 = vadd.xlane.f32.xlu0 %v49_v4  ;;  %v58_v6 = vsel %vm48_vm0, %v558_v2, 0.0  ;;  %v52_v7 = vsel %vm48_vm0, %v567_v5, 0.0  ;;  %v66_v8 = vmul.f32 %v567_v5, %v567_v5  ;;  %v68_v12 = vmul.f32 %v558_v2, %v558_v2  ;;  %v427_v17 = vld [vmem:[%s651_s3 + $0x8] sm:$0xff]   ;;  %v428_v18 = vld [vmem:[%s653_s5] sm:$0xff]   ;;  %s365_s12 = sshll.u32 %s490_s11, 4  ;;  %s366_s12 = int_to_ptr.vmem [resolvable:$true] %s365_s12 }
  0x16   :  { %v69_v11 = vsel %vm48_vm0, %v65_v9, 0.0  ;;  %v75_v15 = vsel %vm48_vm0, %v67_v13, 0.0  ;;  %401 = vmatprep.subr.bf16.mxu0 %v426_v16  ;;  %v429_v19 = vld [vmem:[%s653_s5 + $0x8] sm:$0xff]   ;;  %409 = vmatprep.subr.bf16.mxu1 %v428_v18  ;;  %v377_v55 = vld [vmem:[%s649_s1] ss:$0 sm:$0xff]  ;;  %p467_p9 = scmp.lt.s32.totalorder %s366_s12, %s366_s12 }
  0x17   :  { %v72_v10 = vsel %vm48_vm0, %v66_v8, 0.0  ;;  %v78_v14 = vsel %vm48_vm0, %v68_v12, 0.0  ;;  %402 = vmatpush3.bf16.msra.mxu0 %v426_v16  ;;  %410 = vmatpush3.bf16.msra.mxu1 %v428_v18  ;;  %v378_v58 = vld [vmem:[%s650_s2] ss:$0 sm:$0xff]  ;;  %v430_v18 = vld [vmem:[%s653_s5 + $0x10] sm:$0xff]  }
  0x18   :  { %403 = vmatprep.subr.bf16.mxu0 %v427_v17  ;;  %411 = vmatprep.subr.bf16.mxu1 %v429_v19 }
  0x19   :  { %59 = vadd.xlane.f32.xlu1 %v58_v6  ;;  %53 = vadd.xlane.f32.xlu0 %v52_v7 }
  0x1b   :  { %404 = vmatpush3.bf16.msra.mxu0 %v427_v17  ;;  %412 = vmatpush3.bf16.msra.mxu1 %v429_v19  ;;  %v431_v19 = vld [vmem:[%s653_s5 + $0x18] sm:$0xff]  }
  0x1c   :  { %413 = vmatprep.subr.bf16.mxu1 %v430_v18 }
  0x1d   :  { %73 = vadd.xlane.f32.xlu1 %v72_v10  ;;  %70 = vadd.xlane.f32.xlu0 %v69_v11 }
  0x1f   :  { %414 = vmatpush3.bf16.msra.mxu1 %v430_v18 }
  0x20   :  { %415 = vmatprep.subr.bf16.mxu1 %v431_v19 }
  0x21   :  { %79 = vadd.xlane.f32.xlu1 %v78_v14  ;;  %76 = vadd.xlane.f32.xlu0 %v75_v15 }
  0x23   :  { %416 = vmatpush3.bf16.msra.mxu1 %v431_v19 }
  0xa2   :  { %v57_v20 = vpop.xlane.xlu1 %56  ;;  %v51_v21 = vpop.xlane.xlu0 %50 }
  0xa3   :  { %v61_v24 = vmul.f32 0.03125, %v51_v21  ;;  %v63_v26 = vmul.f32 0.03125, %v57_v20  ;;  %v489_v20 = vmov 0.0   ;;  %v379_v21 = vld [vmem:[#allocation4] ss:$0 sm:$0xff] }
  0xa4   :  { %141 = vst.msk [vmem:[#allocation3 + $0x10] sm:$0xff] %vm48_vm0, %v489_v20  ;;  %139 = vst.msk [vmem:[#allocation3] sm:$0xff] %vm48_vm0, %v489_v20 }
  0xa5   :  { %v85_v30 = vmul.f32 %v61_v24, %v61_v24  ;;  %v87_v36 = vmul.f32 %v63_v26, %v63_v26  ;;  %v97_v54 = vsub.f32 %v553_v1, %v61_v24  ;;  %v99_v63 = vsub.f32 %v548_v0, %v63_v26  ;;  %140 = vst.msk [vmem:[#allocation3 + $0x8] sm:$0xff] %vm48_vm0, %v489_v20 }
  0xa6   :  { %v60_v22 = vpop.xlane.xlu1 %59  ;;  %v54_v23 = vpop.xlane.xlu0 %53  ;;  %142 = vst.msk [vmem:[#allocation3 + $0x18] sm:$0xff] %vm48_vm0, %v489_v20 }
  0xa7   :  { %v62_v25 = vmul.f32 0.03125, %v54_v23  ;;  %v64_v27 = vmul.f32 0.03125, %v60_v22 }
  0xa9   :  { %v86_v31 = vmul.f32 %v62_v25, %v62_v25  ;;  %v88_v37 = vmul.f32 %v64_v27, %v64_v27  ;;  %v98_v52 = vsub.f32 %v567_v5, %v62_v25  ;;  %v100_v60 = vsub.f32 %v558_v2, %v64_v27 }
  0xaa   :  { %v74_v28 = vpop.xlane.xlu1 %73  ;;  %v71_v29 = vpop.xlane.xlu0 %70 }
  0xab   :  { %v82_v32 = vmul.f32 0.03125, %v74_v28  ;;  %v81_v33 = vmul.f32 0.03125, %v71_v29 }
  0xad   :  { %v90_v34 = vsub.f32 %v82_v32, %v86_v31  ;;  %v89_v35 = vsub.f32 %v81_v33, %v85_v30 }
  0xae   :  { %v80_v38 = vpop.xlane.xlu1 %79  ;;  %v77_v39 = vpop.xlane.xlu0 %76 }
  0xaf   :  { %v94_v40 = vmax.f32 %v90_v34, 0.0  ;;  %v93_v41 = vmax.f32 %v89_v35, 0.0  ;;  %v84_v42 = vmul.f32 0.03125, %v80_v38  ;;  %v83_v43 = vmul.f32 0.03125, %v77_v39  ;;  %v231_v39 = vld [vmem:[#allocation3 + $0x18] sm:$0xff] }
  0xb1   :  { %v102_v44 = vadd.f32 1e-06, %v94_v40  ;;  %v101_v45 = vadd.f32 1e-06, %v93_v41  ;;  %v92_v46 = vsub.f32 %v84_v42, %v88_v37  ;;  %v91_v47 = vsub.f32 %v83_v43, %v87_v36  ;;  %v230_v36 = vld [vmem:[#allocation3 + $0x10] sm:$0xff]  ;;  %v228_v37 = vld [vmem:[#allocation3] sm:$0xff] }
  0xb2   :  { %v229_v42 = vld [vmem:[#allocation3 + $0x8] sm:$0xff] }
  0xb3   :  { %432 = vrsqrt.f32 %v102_v44  ;;  %v96_v48 = vmax.f32 %v92_v46, 0.0  ;;  %v95_v49 = vmax.f32 %v91_v47, 0.0 }
  0xb4   :  { %434 = vrsqrt.f32 %v101_v45 }
  0xb5   :  { %v104_v50 = vadd.f32 1e-06, %v96_v48  ;;  %v103_v51 = vadd.f32 1e-06, %v95_v49  ;;  %v390_v48 = vld [vmem:[%s654_s6] ss:$0 sm:$0xff] }
  0xb6   :  { %s462_s6 = scalar_lea.vmem %s366_s12, 512 }
  0xb7   :  { %436 = vrsqrt.f32 %v104_v50  ;;  %p463_p8 = scmp.ne.s32.totalorder %s366_s12, %s462_s6  ;;  %p468_p10 = scmp.lt.s32.totalorder %s462_s6, %s462_s6 }
  0xb8   :  { %438 = vrsqrt.f32 %v103_v51 }
  0xb9   :  { %p469_p11 = por %p468_p10, %p467_p9 }
  0xbb   :  { %p470_p12 = pnand %p469_p11, %p463_p8 }
  0xbd   :  { %v433_v53 = vpop.eup %432 }
  0xbe   :  { %v435_v56 = vpop.eup %434  ;;  %v110_v57 = vmul.f32 %v433_v53, %v98_v52 }
  0xbf   :  { %v109_v59 = vmul.f32 %v435_v56, %v97_v54 }
  0xc0   :  { %v121_v61 = vmul.f32 %v377_v55, %v110_v57 }
  0xc1   :  { %v437_v62 = vpop.eup %436  ;;  %v120_v3 = vmul.f32 %v377_v55, %v109_v59 }
  0xc2   :  { %v439_v4 = vpop.eup %438  ;;  %v132_v6 = vadd.f32 %v378_v58, %v121_v61  ;;  %v112_v7 = vmul.f32 %v437_v62, %v100_v60 }
  0xc3   :  { %v131_v8 = vadd.f32 %v378_v58, %v120_v3  ;;  %v111_v9 = vmul.f32 %v439_v4, %v99_v63 }
  0xc4   :  { %v123_v10 = vmul.f32 %v377_v55, %v112_v7 }
  0xc5   :  { %v135_v11 = vpack.c.bf16 %v132_v6, %v131_v8  ;;  %v122_v12 = vmul.f32 %v377_v55, %v111_v9 }
  0xc6   :  { %v134_v13 = vadd.f32 %v378_v58, %v123_v10 }
  0xc7   :  { %137 = vst.msk [vmem:[#allocation2] sm:$0xff] %vm48_vm0, %v135_v11  ;;  %v133_v14 = vadd.f32 %v378_v58, %v122_v12 }
  0xc9   :  { %v136_v15 = vpack.c.bf16 %v134_v13, %v133_v14 }
  0xcb   :  { %138 = vst.msk [vmem:[#allocation2 + $0x8] sm:$0xff] %vm48_vm0, %v136_v15 }
  0xce   :  { %v143_v16 = vld [vmem:[#allocation2] sm:$0xff] }
  0xcf   :  { %405 = vmatprep.mubr.msk.bf16.mxu0 %vm48_vm0, %v143_v16 }
  0xd2   :  { %v144_v17 = vld [vmem:[#allocation2 + $0x8] sm:$0xff] }
  0xd3   :  { %406 = vmatmul.mubr.msk.bf16.vlgmr.msra.gmra.mrb[0].mxu0 %vm48_vm0, %v144_v17 }
 0x1a6   :  { %v407_v22 = vpop.f32.mrb[0].mxu0 }
 0x1a7   :  { %v218_v23 = vadd.f32 %v407_v22, %v379_v21  ;;  %v209_v24 = vpop.f32.mrb[1].mxu0 }
 0x1a8   :  { %v210_v25 = vadd.f32 %v379_v21, %v209_v24  ;;  %v408_v26 = vpop.f32.mrb[2].mxu0 }
 0x1a9   :  { %v221_v27 = vadd.f32 %v408_v26, %v379_v21  ;;  %v212_v28 = vpop.f32.mrb[3].mxu0  ;;  %v226_v30 = vmax.f32 %v218_v23, 0.0 }
 0x1aa   :  { %v213_v29 = vadd.f32 %v379_v21, %v212_v28  ;;  %v224_v32 = vmax.f32 %v210_v25, 0.0 }
 0x1ab   :  { %v227_v31 = vmax.f32 %v221_v27, 0.0 }
 0x1ac   :  { %v225_v33 = vmax.f32 %v213_v29, 0.0 }
 0x1ad   :  { %v233_v34 = vpack.c.bf16 %v227_v31, %v226_v30 }
 0x1ae   :  { %v232_v35 = vpack.c.bf16 %v225_v33, %v224_v32 }
 0x1b0   :  { %417 = vmatprep.mubr.msk.bf16.mxu1 %vm266_vm1, %v232_v35 }
 0x1b1   :  { %418 = vmatmul.mubr.msk.bf16.vlgmr.msra.gmra.mrb[0].mxu1 %vm266_vm1, %v233_v34 }
 0x284   :  { %v419_v38 = vpop.f32.mrb[0].mxu1 }
 0x285   :  { %v324_v40 = vadd.f32 %v419_v38, %v230_v36  ;;  %v307_v41 = vpop.f32.mrb[1].mxu1 }
 0x286   :  { %v322_v43 = vadd.f32 %v307_v41, %v228_v37  ;;  %v420_v44 = vpop.f32.mrb[2].mxu1 }
 0x287   :  { %328 = vst.msk [vmem:[#allocation3 + $0x10] sm:$0xff] %vm48_vm0, %v324_v40  ;;  %v325_v45 = vadd.f32 %v420_v44, %v231_v39  ;;  %v310_v46 = vpop.f32.mrb[3].mxu1 }
 0x288   :  { %326 = vst.msk [vmem:[#allocation3] sm:$0xff] %vm48_vm0, %v322_v43  ;;  %v323_v47 = vadd.f32 %v310_v46, %v229_v42 }
 0x289   :  { %329 = vst.msk [vmem:[#allocation3 + $0x18] sm:$0xff] %vm48_vm0, %v325_v45 }
 0x28a   :  { %327 = vst.msk [vmem:[#allocation3 + $0x8] sm:$0xff] %vm48_vm0, %v323_v47 }
 0x28e   :  { %v335_v49 = vld [vmem:[#allocation3 + $0x10] sm:$0xff] }
 0x28f   :  { %v333_v50 = vld [vmem:[#allocation3] sm:$0xff]  ;;  %v346_v51 = vadd.f32 %v390_v48, %v335_v49 }
 0x290   :  { %v336_v52 = vld [vmem:[#allocation3 + $0x18] sm:$0xff]  ;;  %v344_v53 = vadd.f32 %v390_v48, %v333_v50 }
 0x291   :  { %v334_v54 = vld [vmem:[#allocation3 + $0x8] sm:$0xff]  ;;  %v347_v55 = vadd.f32 %v390_v48, %v336_v52  ;;  %v354_v56 = vadd.f32 %v346_v51, %v548_v0 }
 0x292   :  { %v345_v57 = vadd.f32 %v390_v48, %v334_v54  ;;  %v352_v58 = vadd.f32 %v344_v53, %v553_v1 }
 0x293   :  { %v355_v59 = vadd.f32 %v347_v55, %v558_v2  ;;  %358 = vst.msk [vmem:[#allocation7 + $0x10] sm:$0xff] %vm48_vm0, %v354_v56 }
 0x294   :  { %v353_v60 = vadd.f32 %v345_v57, %v567_v5  ;;  %356 = vst.msk [vmem:[#allocation7] sm:$0xff] %vm48_vm0, %v352_v58 }
 0x295   :  { %359 = vst.msk [vmem:[#allocation7 + $0x18] sm:$0xff] %vm48_vm0, %v355_v59 }
 0x296   :  { %357 = vst.msk [vmem:[#allocation7 + $0x8] sm:$0xff] %vm48_vm0, %v353_v60 }
 0x297   :  { %473 = shalt.err (!%p470_p12)
}
 0x298   :  { %s474_s15 = scalar_lea.hbm %s655_s7, 512 }
 0x299   :  { %p475_p13 = scmp.ne.s32.totalorder %s655_s7, %s474_s15  ;;  %p478_p0 = scmp.lt.u32.totalorder %s474_s15, %s655_s7 }
 0x29b   :  { %p480_p1 = pnand %p478_p0, %p475_p13 }
 0x29d   :  { %483 = shalt.err (!%p480_p1)
}
 0x29e   :  { %s491_s4 = smov 128   ;;  %s492_s20 = smov 8  }
 0x29f   :  { %371 = dma.vmem_to_hbm [thread:$0]  %s366_s12, 512, %s655_s7, [#allocation6], %s491_s4, %s491_s4, %s492_s20  }
 0x2a0   :  { %486 = dma.done.wait [#allocation6], 512  }
 0x2a1   :  { %487 = vsyncadd [#allocation6], 4294966784 }
 0x2a2   :  { %375 = vsyncpa [#allocation5], 1 }
 0x2a3   :  { %376 = vsyncpa [#allocation6], 1 }

</bundles_post_ra>
